<compile_context>
chip_gen: v7x
topology: tpu7x:2x2x1
jax: 0.10.0
libtpu: 0.0.40
codegen_flags: <defaults>
</compile_context>

<pallas_src>
import functools

import jax
import jax.numpy as jnp
import numpy as np
from jax.experimental import pallas as pl
from jax.experimental.pallas import tpu as pltpu

LANE = 128
SUBLANE = 8


def _round_up(x, m):
    return ((x + m - 1) // m) * m


def _elu(x):
    # F.elu(alpha=1).  Clamp before exp so the discarded select branch cannot
    # overflow.  (expm1 would be marginally more accurate near 0, but exp-1 is
    # kept for guaranteed Mosaic lowering; the error is far below bf16 noise.)
    return jnp.where(x > 0, x, jnp.exp(jnp.minimum(x, 0.0)) - 1.0)


def mpn_kernel(x_ref, bc_ref, bias0_ref, bias1_ref, bias2_ref,
               w0_ref, w1_ref, w2_ref, out_ref, *,
               n_experts, out_pads, n_chunks):
    """One batch tile of the blended 3-layer MLP (output-side expert blending).

    x_ref    : (TB, in0_p)          lane-padded input features (f32)
    bc_ref   : (TB, E_pad)          lane-padded blending coefficients (f32)
    biasK_ref: (TB, outK_p)         pre-blended biases (f32)
    wK_ref   : (inK_p, E*outK_p)    packed [W_0^T | ... | W_{E-1}^T] (compute dtype)
    out_ref  : (TB, out2_p)         f32 output
    """
    tb = x_ref.shape[0]
    rows = tb // n_chunks
    h0_p, h1_p, out2_p = out_pads

    # Independent half-tiles traced in one basic block -> the scheduler can
    # overlap one chunk's MXU matmul with the other chunk's VPU blend/ELU/cast.
    for c in range(n_chunks):
        sl = slice(c * rows, (c + 1) * rows)

        # Hoisted once per chunk; reused by all three layers (JAX does not CSE
        # the column extract / broadcast).
        bc = bc_ref[sl, :]
        bc_cols = [bc[:, e:e + 1] for e in range(n_experts)]

        def layer(h, w_ref, bias_ref, out_p):
            # One MXU contraction with all experts stacked along N, then an
            # E-term FMA reduction in f32 on the VPU seeded with the blended
            # bias.  Column slices are 128-aligned (out_p is a lane multiple).
            y = jnp.dot(h, w_ref[...], preferred_element_type=jnp.float32)
            acc = bias_ref[sl, :]
            for e in range(n_experts):
                acc = acc + bc_cols[e] * y[:, e * out_p:(e + 1) * out_p]
            return acc

        h = x_ref[sl, :].astype(w0_ref.dtype)
        a0 = _elu(layer(h, w0_ref, bias0_ref, h0_p)).astype(w1_ref.dtype)
        a1 = _elu(layer(a0, w1_ref, bias1_ref, h1_p)).astype(w2_ref.dtype)
        out_ref[sl, :] = layer(a1, w2_ref, bias2_ref, out2_p).astype(out_ref.dtype)


def prepare_params(w0, b0, w1, b1, w2, b2, compute_dtype=jnp.bfloat16):
    """One-time (off the hot path) packing of the expert parameters.

    wK: (E, outK, inK) -> (inK_p, E*outK_p) where column block e holds W_e^T
    (zero-padded to lane multiples), cast to the MXU compute dtype.  Biases are
    returned untouched in f32 -- they are blended with bc per call (a tiny XLA
    matmul) and added on the VPU inside the kernel.
    """
    E = w0.shape[0]

    def pack(w):
        _, out, inn = w.shape
        in_p, out_p = _round_up(inn, LANE), _round_up(out, LANE)
        wt = jnp.transpose(w, (0, 2, 1))                               # (E, in, out)
        wt = jnp.pad(wt, ((0, 0), (0, in_p - inn), (0, out_p - out)))
        return (jnp.transpose(wt, (1, 0, 2))                           # (in_p, E, out_p)
                .reshape(in_p, E * out_p).astype(compute_dtype))

    return (pack(w0), pack(w1), pack(w2),
            jnp.asarray(b0, jnp.float32),
            jnp.asarray(b1, jnp.float32),
            jnp.asarray(b2, jnp.float32))


@functools.partial(jax.jit, static_argnames=("n_output", "block_batch"))
def motion_prediction_forward(x, bc, params, *, n_output, block_batch=512):
    """x: (B, n_input) f32, bc: (B, E) f32, params from prepare_params.

    block_batch: max batch tile.  512 suits v6e/v7x (MXU-bound with resident
    weights, amortizes per-step overhead); 256 is also fine on v5e.
    """
    w0p, w1p, w2p, b0, b1, b2 = params
    B, n_in = x.shape
    E = bc.shape[1]
    e_pad = _round_up(E, LANE)
    in0_p = w0p.shape[0]
    h0_p, h1_p, out2_p = (w0p.shape[1] // E, w1p.shape[1] // E, w2p.shape[1] // E)

    # Batch tiling: tiles are multiples of 8 sublanes; prefer >= 2 grid steps so
    # the "parallel" axis can be sharded across both TensorCores on v7x.
    b8 = _round_up(B, SUBLANE)
    if b8 <= block_batch:
        if b8 >= 2 * SUBLANE:
            b_pad = _round_up(b8, 2 * SUBLANE)
            tb = b_pad // 2
        else:
            tb, b_pad = b8, b8
    else:
        tb = block_batch
        b_pad = _round_up(B, tb)
    # Two independent half-tiles inside the body (needs rows to stay a sublane
    # multiple) give the scheduler MXU/VPU work to interleave.
    n_chunks = 2 if (tb % (2 * SUBLANE) == 0) else 1

    bcf = bc.astype(jnp.float32)
    # Pre-blend the biases with bc (tiny (B,E)x(E,out) XLA matmuls): keeps the
    # bias/bc block out of the MXU contraction and the add exact in f32.
    bias0 = bcf @ b0
    bias1 = bcf @ b1
    bias2 = bcf @ b2

    def pad2(a, rows, cols):
        return jnp.pad(a, ((0, rows - a.shape[0]), (0, cols - a.shape[1])))

    xp = pad2(x.astype(jnp.float32), b_pad, in0_p)
    bcp = pad2(bcf, b_pad, e_pad)
    bias0 = pad2(bias0, b_pad, h0_p)
    bias1 = pad2(bias1, b_pad, h1_p)
    bias2 = pad2(bias2, b_pad, out2_p)

    # VMEM budget: resident packed weights counted at 2x (possible double
    # buffering even for constant-index blocks), double-buffered batch tiles,
    # live f32 intermediates (y buffers + activations) with 2x headroom; capped
    # at 56 MiB to leave slack inside v7x's 64 MiB for compiler scratch.
    w_bytes = sum(a.size * a.dtype.itemsize for a in (w0p, w1p, w2p))
    io_bytes = 2 * 4 * tb * (in0_p + e_pad + h0_p + h1_p + 2 * out2_p)
    act_bytes = 4 * tb * (E * max(h0_p, h1_p, out2_p) + in0_p + h0_p + h1_p + out2_p)
    vmem_limit = int(min(max(2 * w_bytes + io_bytes + 2 * act_bytes, 32 << 20),
                         56 << 20))

    def batch_spec(cols):
        return pl.BlockSpec((tb, cols), lambda i: (i, 0))

    grid = (b_pad // tb,)
    out_padded = pl.pallas_call(
        functools.partial(mpn_kernel, n_experts=E,
                          out_pads=(h0_p, h1_p, out2_p), n_chunks=n_chunks),
        out_shape=jax.ShapeDtypeStruct((b_pad, out2_p), jnp.float32),
        grid=grid,
        in_specs=[
            batch_spec(in0_p),          # x
            batch_spec(e_pad),          # bc
            batch_spec(h0_p),           # pre-blended bias 0
            batch_spec(h1_p),           # pre-blended bias 1
            batch_spec(out2_p),         # pre-blended bias 2
            # Packed weights: same full block every step -> VMEM-resident.
            pl.BlockSpec(w0p.shape, lambda i: (0, 0)),
            pl.BlockSpec(w1p.shape, lambda i: (0, 0)),
            pl.BlockSpec(w2p.shape, lambda i: (0, 0)),
        ],
        out_specs=pl.BlockSpec((tb, out2_p), lambda i: (i, 0)),
        compiler_params=pltpu.CompilerParams(
            dimension_semantics=("parallel",),
            vmem_limit_bytes=vmem_limit),
    )(xp, bcp, bias0, bias1, bias2, w0p, w1p, w2p)

    return out_padded[:B, :n_output]


def reference_forward(x, bc, w0, b0, w1, b1, w2, b2):
    """Pure-JAX mirror of the PyTorch forward (blend then baddbmm), eval mode."""
    def blend_w(w):   # (B,E) x (E,out,in) -> (B,out,in)
        return jnp.einsum('be,eoi->boi', bc, w)

    def blend_b(b):   # (B,E) x (E,out) -> (B,out)
        return bc @ b

    W0, B0 = blend_w(w0), blend_b(b0)
    W1, B1 = blend_w(w1), blend_b(b1)
    W2, B2 = blend_w(w2), blend_b(b2)

    h = jax.nn.elu(jnp.einsum('boi,bi->bo', W0, x) + B0)
    h = jax.nn.elu(jnp.einsum('boi,bi->bo', W1, h) + B1)
    return jnp.einsum('boi,bi->bo', W2, h) + B2


def init_params(key, n_input, n_output, n_experts, h):
    """Test init: uniform(+-1/sqrt(fan_in)) weights and nonzero biases so the
    bias-blend path is exercised (the module itself zeros biases at init)."""
    ks = jax.random.split(key, 6)

    def u(k, shape, fan_in):
        bound = 1.0 / np.sqrt(fan_in)
        return jax.random.uniform(k, shape, jnp.float32, -bound, bound)

    w0 = u(ks[0], (n_experts, h[0], n_input), n_input)
    w1 = u(ks[1], (n_experts, h[1], h[0]), h[0])
    w2 = u(ks[2], (n_experts, n_output, h[1]), h[1])
    b0 = u(ks[3], (n_experts, h[0]), h[0])
    b1 = u(ks[4], (n_experts, h[1]), h[1])
    b2 = u(ks[5], (n_experts, n_output), n_output)
    return w0, b0, w1, b1, w2, b2


if __name__ == "__main__":
    # Small shapes consistent with the module's forward.
    n_input = 32
    n_output = 16
    n_experts = 4
    h = [64, 64]

    key = jax.random.PRNGKey(0)
    kx, kbc, kp = jax.random.split(key, 3)
    w0, b0, w1, b1, w2, b2 = init_params(kp, n_input, n_output, n_experts, h)

    packed_bf16 = prepare_params(w0, b0, w1, b1, w2, b2, compute_dtype=jnp.bfloat16)
    packed_f32 = prepare_params(w0, b0, w1, b1, w2, b2, compute_dtype=jnp.float32)

    # B=8: tiny single-tile / single-chunk path.
    # B=30: two grid steps, two in-kernel half-tiles, and batch-row padding.
    for B in (8, 30):
        x = jax.random.normal(jax.random.fold_in(kx, B), (B, n_input), jnp.float32)
        bc = jax.nn.softmax(
            jax.random.normal(jax.random.fold_in(kbc, B), (B, n_experts), jnp.float32),
            axis=-1)

        ref = reference_forward(x, bc, w0, b0, w1, b1, w2, b2)

        # Default path: bf16 MXU inputs, f32 accumulation, f32 bias/blend.
        out_bf16 = jax.block_until_ready(
            motion_prediction_forward(x, bc, packed_bf16, n_output=n_output))
        np.testing.assert_allclose(np.asarray(out_bf16), np.asarray(ref),
                                   rtol=5e-2, atol=5e-3)

        # f32-matmul path: tighter check of the packing / blending semantics.
        out_f32 = jax.block_until_ready(
            motion_prediction_forward(x, bc, packed_f32, n_output=n_output))
        np.testing.assert_allclose(np.asarray(out_f32), np.asarray(ref),
                                   rtol=1e-3, atol=1e-4)

    print("KERNEL_OK")
</pallas_src>

<mosaic_0001>
module attributes {stable_mosaic.version = 11 : i64} {
  func.func @mpn_kernel(%arg0: i32, %arg1: memref<8x128xf32, #tpu.memory_space<vmem>>, %arg2: memref<8x128xf32, #tpu.memory_space<vmem>>, %arg3: memref<8x128xf32, #tpu.memory_space<vmem>>, %arg4: memref<8x128xf32, #tpu.memory_space<vmem>>, %arg5: memref<8x128xf32, #tpu.memory_space<vmem>>, %arg6: memref<128x512xbf16, #tpu.memory_space<vmem>>, %arg7: memref<128x512xbf16, #tpu.memory_space<vmem>>, %arg8: memref<128x512xbf16, #tpu.memory_space<vmem>>, %arg9: memref<8x128xf32, #tpu.memory_space<vmem>>) attributes {dimension_semantics = [#tpu.dimension_semantics<parallel>], iteration_bounds = array<i64: 1>, scalar_prefetch = 0 : i64, scratch_operands = 0 : i64, tpu.core_type = #tpu.core_type<tc>, window_params = [{transform_indices = @transform_0, window_bounds = array<i64: 8, 128>}, {transform_indices = @transform_1, window_bounds = array<i64: 8, 128>}, {transform_indices = @transform_2, window_bounds = array<i64: 8, 128>}, {transform_indices = @transform_3, window_bounds = array<i64: 8, 128>}, {transform_indices = @transform_4, window_bounds = array<i64: 8, 128>}, {pipeline_mode = #tpu.pipeline_mode<synchronous>, transform_indices = @transform_5, window_bounds = array<i64: 128, 512>}, {pipeline_mode = #tpu.pipeline_mode<synchronous>, transform_indices = @transform_6, window_bounds = array<i64: 128, 512>}, {pipeline_mode = #tpu.pipeline_mode<synchronous>, transform_indices = @transform_7, window_bounds = array<i64: 128, 512>}, {transform_indices = @transform_8, window_bounds = array<i64: 8, 128>}]} {
    %c0 = arith.constant 0 : index
    %c0_0 = arith.constant 0 : index
    %0 = vector.load %arg2[%c0, %c0_0] : memref<8x128xf32, #tpu.memory_space<vmem>>, vector<8x128xf32>
    %1 = vector.extract_strided_slice %0 {offsets = [0, 0], sizes = [8, 1], strides = [1, 1]} : vector<8x128xf32> to vector<8x1xf32>
    %2 = vector.extract_strided_slice %0 {offsets = [0, 1], sizes = [8, 1], strides = [1, 1]} : vector<8x128xf32> to vector<8x1xf32>
    %3 = vector.extract_strided_slice %0 {offsets = [0, 2], sizes = [8, 1], strides = [1, 1]} : vector<8x128xf32> to vector<8x1xf32>
    %4 = vector.extract_strided_slice %0 {offsets = [0, 3], sizes = [8, 1], strides = [1, 1]} : vector<8x128xf32> to vector<8x1xf32>
    %c0_1 = arith.constant 0 : index
    %c0_2 = arith.constant 0 : index
    %5 = vector.load %arg1[%c0_1, %c0_2] : memref<8x128xf32, #tpu.memory_space<vmem>>, vector<8x128xf32>
    %6 = arith.truncf %5 : vector<8x128xf32> to vector<8x128xbf16>
    %c0_3 = arith.constant 0 : index
    %c0_4 = arith.constant 0 : index
    %7 = vector.load %arg6[%c0_3, %c0_4] : memref<128x512xbf16, #tpu.memory_space<vmem>>, vector<128x512xbf16>
    %cst = arith.constant dense<0.000000e+00> : vector<8x512xf32>
    %8 = tpu.matmul %6, %7, %cst {dimension_numbers = #tpu.dot_dimension_numbers<[1], [0], [0], [1], [0, 0, 1, 1], [], []>} : vector<8x128xbf16>, vector<128x512xbf16>, vector<8x512xf32> -> vector<8x512xf32>
    %c0_5 = arith.constant 0 : index
    %c0_6 = arith.constant 0 : index
    %9 = vector.load %arg3[%c0_5, %c0_6] : memref<8x128xf32, #tpu.memory_space<vmem>>, vector<8x128xf32>
    %10 = vector.extract_strided_slice %8 {offsets = [0, 0], sizes = [8, 128], strides = [1, 1]} : vector<8x512xf32> to vector<8x128xf32>
    %11 = vector.broadcast %1 : vector<8x1xf32> to vector<8x128xf32>
    %12 = arith.mulf %11, %10 : vector<8x128xf32>
    %13 = arith.addf %9, %12 : vector<8x128xf32>
    %14 = vector.extract_strided_slice %8 {offsets = [0, 128], sizes = [8, 128], strides = [1, 1]} : vector<8x512xf32> to vector<8x128xf32>
    %15 = vector.broadcast %2 : vector<8x1xf32> to vector<8x128xf32>
    %16 = arith.mulf %15, %14 : vector<8x128xf32>
    %17 = arith.addf %13, %16 : vector<8x128xf32>
    %18 = vector.extract_strided_slice %8 {offsets = [0, 256], sizes = [8, 128], strides = [1, 1]} : vector<8x512xf32> to vector<8x128xf32>
    %19 = vector.broadcast %3 : vector<8x1xf32> to vector<8x128xf32>
    %20 = arith.mulf %19, %18 : vector<8x128xf32>
    %21 = arith.addf %17, %20 : vector<8x128xf32>
    %22 = vector.extract_strided_slice %8 {offsets = [0, 384], sizes = [8, 128], strides = [1, 1]} : vector<8x512xf32> to vector<8x128xf32>
    %23 = vector.broadcast %4 : vector<8x1xf32> to vector<8x128xf32>
    %24 = arith.mulf %23, %22 : vector<8x128xf32>
    %25 = arith.addf %21, %24 : vector<8x128xf32>
    %cst_7 = arith.constant 0.000000e+00 : f32
    %26 = vector.broadcast %cst_7 : f32 to vector<8x128xf32>
    %27 = arith.cmpf ogt, %25, %26 : vector<8x128xf32>
    %cst_8 = arith.constant 0.000000e+00 : f32
    %28 = vector.broadcast %cst_8 : f32 to vector<8x128xf32>
    %29 = arith.minimumf %25, %28 : vector<8x128xf32>
    %30 = math.exp %29 : vector<8x128xf32>
    %cst_9 = arith.constant 1.000000e+00 : f32
    %31 = vector.broadcast %cst_9 : f32 to vector<8x128xf32>
    %32 = arith.subf %30, %31 : vector<8x128xf32>
    %33 = arith.select %27, %25, %32 : vector<8x128xi1>, vector<8x128xf32>
    %34 = arith.truncf %33 : vector<8x128xf32> to vector<8x128xbf16>
    %c0_10 = arith.constant 0 : index
    %c0_11 = arith.constant 0 : index
    %35 = vector.load %arg7[%c0_10, %c0_11] : memref<128x512xbf16, #tpu.memory_space<vmem>>, vector<128x512xbf16>
    %cst_12 = arith.constant dense<0.000000e+00> : vector<8x512xf32>
    %36 = tpu.matmul %34, %35, %cst_12 {dimension_numbers = #tpu.dot_dimension_numbers<[1], [0], [0], [1], [0, 0, 1, 1], [], []>} : vector<8x128xbf16>, vector<128x512xbf16>, vector<8x512xf32> -> vector<8x512xf32>
    %c0_13 = arith.constant 0 : index
    %c0_14 = arith.constant 0 : index
    %37 = vector.load %arg4[%c0_13, %c0_14] : memref<8x128xf32, #tpu.memory_space<vmem>>, vector<8x128xf32>
    %38 = vector.extract_strided_slice %36 {offsets = [0, 0], sizes = [8, 128], strides = [1, 1]} : vector<8x512xf32> to vector<8x128xf32>
    %39 = vector.broadcast %1 : vector<8x1xf32> to vector<8x128xf32>
    %40 = arith.mulf %39, %38 : vector<8x128xf32>
    %41 = arith.addf %37, %40 : vector<8x128xf32>
    %42 = vector.extract_strided_slice %36 {offsets = [0, 128], sizes = [8, 128], strides = [1, 1]} : vector<8x512xf32> to vector<8x128xf32>
    %43 = vector.broadcast %2 : vector<8x1xf32> to vector<8x128xf32>
    %44 = arith.mulf %43, %42 : vector<8x128xf32>
    %45 = arith.addf %41, %44 : vector<8x128xf32>
    %46 = vector.extract_strided_slice %36 {offsets = [0, 256], sizes = [8, 128], strides = [1, 1]} : vector<8x512xf32> to vector<8x128xf32>
    %47 = vector.broadcast %3 : vector<8x1xf32> to vector<8x128xf32>
    %48 = arith.mulf %47, %46 : vector<8x128xf32>
    %49 = arith.addf %45, %48 : vector<8x128xf32>
    %50 = vector.extract_strided_slice %36 {offsets = [0, 384], sizes = [8, 128], strides = [1, 1]} : vector<8x512xf32> to vector<8x128xf32>
    %51 = vector.broadcast %4 : vector<8x1xf32> to vector<8x128xf32>
    %52 = arith.mulf %51, %50 : vector<8x128xf32>
    %53 = arith.addf %49, %52 : vector<8x128xf32>
    %cst_15 = arith.constant 0.000000e+00 : f32
    %54 = vector.broadcast %cst_15 : f32 to vector<8x128xf32>
    %55 = arith.cmpf ogt, %53, %54 : vector<8x128xf32>
    %cst_16 = arith.constant 0.000000e+00 : f32
    %56 = vector.broadcast %cst_16 : f32 to vector<8x128xf32>
    %57 = arith.minimumf %53, %56 : vector<8x128xf32>
    %58 = math.exp %57 : vector<8x128xf32>
    %cst_17 = arith.constant 1.000000e+00 : f32
    %59 = vector.broadcast %cst_17 : f32 to vector<8x128xf32>
    %60 = arith.subf %58, %59 : vector<8x128xf32>
    %61 = arith.select %55, %53, %60 : vector<8x128xi1>, vector<8x128xf32>
    %62 = arith.truncf %61 : vector<8x128xf32> to vector<8x128xbf16>
    %c0_18 = arith.constant 0 : index
    %c0_19 = arith.constant 0 : index
    %63 = vector.load %arg8[%c0_18, %c0_19] : memref<128x512xbf16, #tpu.memory_space<vmem>>, vector<128x512xbf16>
    %cst_20 = arith.constant dense<0.000000e+00> : vector<8x512xf32>
    %64 = tpu.matmul %62, %63, %cst_20 {dimension_numbers = #tpu.dot_dimension_numbers<[1], [0], [0], [1], [0, 0, 1, 1], [], []>} : vector<8x128xbf16>, vector<128x512xbf16>, vector<8x512xf32> -> vector<8x512xf32>
    %c0_21 = arith.constant 0 : index
    %c0_22 = arith.constant 0 : index
    %65 = vector.load %arg5[%c0_21, %c0_22] : memref<8x128xf32, #tpu.memory_space<vmem>>, vector<8x128xf32>
    %66 = vector.extract_strided_slice %64 {offsets = [0, 0], sizes = [8, 128], strides = [1, 1]} : vector<8x512xf32> to vector<8x128xf32>
    %67 = vector.broadcast %1 : vector<8x1xf32> to vector<8x128xf32>
    %68 = arith.mulf %67, %66 : vector<8x128xf32>
    %69 = arith.addf %65, %68 : vector<8x128xf32>
    %70 = vector.extract_strided_slice %64 {offsets = [0, 128], sizes = [8, 128], strides = [1, 1]} : vector<8x512xf32> to vector<8x128xf32>
    %71 = vector.broadcast %2 : vector<8x1xf32> to vector<8x128xf32>
    %72 = arith.mulf %71, %70 : vector<8x128xf32>
    %73 = arith.addf %69, %72 : vector<8x128xf32>
    %74 = vector.extract_strided_slice %64 {offsets = [0, 256], sizes = [8, 128], strides = [1, 1]} : vector<8x512xf32> to vector<8x128xf32>
    %75 = vector.broadcast %3 : vector<8x1xf32> to vector<8x128xf32>
    %76 = arith.mulf %75, %74 : vector<8x128xf32>
    %77 = arith.addf %73, %76 : vector<8x128xf32>
    %78 = vector.extract_strided_slice %64 {offsets = [0, 384], sizes = [8, 128], strides = [1, 1]} : vector<8x512xf32> to vector<8x128xf32>
    %79 = vector.broadcast %4 : vector<8x1xf32> to vector<8x128xf32>
    %80 = arith.mulf %79, %78 : vector<8x128xf32>
    %81 = arith.addf %77, %80 : vector<8x128xf32>
    %c0_23 = arith.constant 0 : index
    %c0_24 = arith.constant 0 : index
    %82 = vector.load %arg9[%c0_23, %c0_24] : memref<8x128xf32, #tpu.memory_space<vmem>>, vector<8x128xf32>
    tpu.vector_store %arg9[%c0_23, %c0_24], %81 {strides = array<i32>} : memref<8x128xf32, #tpu.memory_space<vmem>>, vector<8x128xf32>,
    return
  }
  func.func @transform_0(%arg0: i32) -> (i32, i32) {
    %c0_i32 = arith.constant 0 : i32
    %c0_i32_0 = arith.constant 0 : i32
    return %arg0, %c0_i32 : i32, i32
  }
  func.func @transform_1(%arg0: i32) -> (i32, i32) {
    %c0_i32 = arith.constant 0 : i32
    %c0_i32_0 = arith.constant 0 : i32
    return %arg0, %c0_i32 : i32, i32
  }
  func.func @transform_2(%arg0: i32) -> (i32, i32) {
    %c0_i32 = arith.constant 0 : i32
    %c0_i32_0 = arith.constant 0 : i32
    return %arg0, %c0_i32 : i32, i32
  }
  func.func @transform_3(%arg0: i32) -> (i32, i32) {
    %c0_i32 = arith.constant 0 : i32
    %c0_i32_0 = arith.constant 0 : i32
    return %arg0, %c0_i32 : i32, i32
  }
  func.func @transform_4(%arg0: i32) -> (i32, i32) {
    %c0_i32 = arith.constant 0 : i32
    %c0_i32_0 = arith.constant 0 : i32
    return %arg0, %c0_i32 : i32, i32
  }
  func.func @transform_5(%arg0: i32) -> (i32, i32) {
    %c0_i32 = arith.constant 0 : i32
    %c0_i32_0 = arith.constant 0 : i32
    %c0_i32_1 = arith.constant 0 : i32
    return %c0_i32, %c0_i32_0 : i32, i32
  }
  func.func @transform_6(%arg0: i32) -> (i32, i32) {
    %c0_i32 = arith.constant 0 : i32
    %c0_i32_0 = arith.constant 0 : i32
    %c0_i32_1 = arith.constant 0 : i32
    return %c0_i32, %c0_i32_0 : i32, i32
  }
  func.func @transform_7(%arg0: i32) -> (i32, i32) {
    %c0_i32 = arith.constant 0 : i32
    %c0_i32_0 = arith.constant 0 : i32
    %c0_i32_1 = arith.constant 0 : i32
    return %c0_i32, %c0_i32_0 : i32, i32
  }
  func.func @transform_8(%arg0: i32) -> (i32, i32) {
    %c0_i32 = arith.constant 0 : i32
    %c0_i32_0 = arith.constant 0 : i32
    return %arg0, %c0_i32 : i32, i32
  }
}

</mosaic_0001>

<bundles_post_ra>
// kernel: motion_prediction_forward.1
= control target key start
LH: loop header
LB: loop body
LE: loop exit
PB: predicated region body
PF: predicated region fallthrough
CT: control target
= control target key end

     0   :  { %13 = vsyncpa [#allocation3], 0  ;;  %s1488_s0 = inlined_call_operand.vmem [shape: f32[8,128], index: 0, kind: input, shape index: {}]   ;;  %s1489_s1 = inlined_call_operand.vmem [shape: f32[8,128], index: 1, kind: input, shape index: {}]   ;;  %s1490_s2 = inlined_call_operand.vmem [shape: f32[8,128], index: 2, kind: input, shape index: {}]   ;;  %s1491_s3 = inlined_call_operand.vmem [shape: f32[8,128], index: 3, kind: input, shape index: {}]   ;;  %s1492_s4 = inlined_call_operand.vmem [shape: f32[8,128], index: 4, kind: input, shape index: {}]   ;;  %s1493_s5 = inlined_call_operand.hbm [shape: bf16[128,512], index: 5, kind: input, shape index: {}]   ;;  %s1494_s6 = inlined_call_operand.hbm [shape: bf16[128,512], index: 6, kind: input, shape index: {}]   ;;  %s1495_s7 = inlined_call_operand.hbm [shape: bf16[128,512], index: 7, kind: input, shape index: {}]   ;;  %s1496_s8 = inlined_call_operand.hbm [shape: f32[8,128], index: 8, kind: output, shape index: {}]  }
   0x1   :  { %14 = vsyncpa [#allocation6], 0 }
   0x2   :  { %15 = vsyncpa [#allocation4], 0  ;;  %s1327_s27 = smov [#allocation5]   ;;  %s1328_s29 = smov [#allocation2]  }
   0x3   :  { %s43_s28 = sshll.u32 %s1327_s27, 4  ;;  %s31_s30 = sshll.u32 %s1328_s29, 4  ;;  %s44_s28 = int_to_ptr.vmem [resolvable:$true] %s43_s28  ;;  %s1382_s30 = int_to_ptr.vmem [resolvable:$true] %s31_s30 }
   0x4   :  { %s1233_s11 = scalar_lea.hbm %s1494_s6, 4096 }
   0x5   :  { %p1234_p0 = scmp.ne.s32.totalorder %s1494_s6, %s1233_s11  ;;  %p1237_p1 = scmp.lt.u32.totalorder %s1233_s11, %s1494_s6 }
   0x7   :  { %p1239_p2 = pnand %p1237_p1, %p1234_p0 }
   0x9   :  { %1242 = shalt.err (!%p1239_p2)
}
   0xa   :  { %s1243_s16 = scalar_lea.vmem %s44_s28, 4096  ;;  %p1248_p4 = scmp.lt.s32.totalorder %s44_s28, %s44_s28 }
   0xb   :  { %p1244_p3 = scmp.ne.s32.totalorder %s44_s28, %s1243_s16  ;;  %p1249_p5 = scmp.lt.s32.totalorder %s1243_s16, %s1243_s16 }
   0xd   :  { %p1250_p6 = por %p1249_p5, %p1248_p4 }
   0xf   :  { %p1251_p7 = pnand %p1250_p6, %p1244_p3 }
  0x11   :  { %1254 = shalt.err (!%p1251_p7)
}
  0x12   :  { %s1329_s17 = smov 256   ;;  %s1330_s18 = smov 16  }
  0x13   :  { %49 = dma.hbm_to_vmem [thread:$0]  %s1494_s6, 4096, %s44_s28, [#allocation6], %s1329_s17, %s1329_s17, %s1330_s18  }
  0x14   :  { %s1255_s23 = scalar_lea.hbm %s1493_s5, 4096 }
  0x15   :  { %p1256_p8 = scmp.ne.s32.totalorder %s1493_s5, %s1255_s23  ;;  %p1259_p9 = scmp.lt.u32.totalorder %s1255_s23, %s1493_s5 }
  0x17   :  { %p1261_p10 = pnand %p1259_p9, %p1256_p8 }
  0x19   :  { %1264 = shalt.err (!%p1261_p10)
}
  0x1a   :  { %s1265_s29 = scalar_lea.vmem %s1382_s30, 4096  ;;  %p1270_p12 = scmp.lt.s32.totalorder %s1382_s30, %s1382_s30 }
  0x1b   :  { %p1266_p11 = scmp.ne.s32.totalorder %s1382_s30, %s1265_s29  ;;  %p1271_p13 = scmp.lt.s32.totalorder %s1265_s29, %s1265_s29 }
  0x1d   :  { %p1272_p0 = por %p1271_p13, %p1270_p12 }
  0x1f   :  { %p1273_p1 = pnand %p1272_p0, %p1266_p11 }
  0x21   :  { %1276 = shalt.err (!%p1273_p1)
}
  0x22   :  { %37 = dma.hbm_to_vmem [thread:$0]  %s1493_s5, 4096, %s1382_s30, [#allocation3], %s1329_s17, %s1329_s17, %s1330_s18  }
  0x23   :  { %s1331_s9 = smov [#allocation7]   ;;  %s1277_s13 = scalar_lea.hbm %s1495_s7, 4096 }
  0x24   :  { %s55_s10 = sshll.u32 %s1331_s9, 4  ;;  %p1278_p2 = scmp.ne.s32.totalorder %s1495_s7, %s1277_s13  ;;  %s56_s10 = int_to_ptr.vmem [resolvable:$true] %s55_s10 }
  0x25   :  { %p1281_p3 = scmp.lt.u32.totalorder %s1277_s13, %s1495_s7 }
  0x27   :  { %p1283_p4 = pnand %p1281_p3, %p1278_p2 }
  0x29   :  { %1286 = shalt.err (!%p1283_p4)
}
  0x2a   :  { %s1287_s20 = scalar_lea.vmem %s56_s10, 4096  ;;  %p1292_p6 = scmp.lt.s32.totalorder %s56_s10, %s56_s10 }
  0x2b   :  { %p1288_p5 = scmp.ne.s32.totalorder %s56_s10, %s1287_s20  ;;  %p1293_p7 = scmp.lt.s32.totalorder %s1287_s20, %s1287_s20 }
  0x2d   :  { %p1294_p8 = por %p1293_p7, %p1292_p6 }
  0x2f   :  { %p1295_p9 = pnand %p1294_p8, %p1288_p5 }
  0x31   :  { %1298 = shalt.err (!%p1295_p9)
}
  0x32   :  { %61 = dma.hbm_to_vmem [thread:$0]  %s1495_s7, 4096, %s56_s10, [#allocation6], %s1329_s17, %s1329_s17, %s1330_s18  }
  0x33   :  { %1321 = dma.done.wait [#allocation3], 4096  }
  0x34   :  { %1322 = vsyncadd [#allocation3], 4294963200 }
  0x35   :  { %1323 = dma.done.wait [#allocation6], 8192  }
  0x36   :  { %1324 = vsyncadd [#allocation6], 4294959104  ;;  %v1332_v0 = vmov 0   ;;  %v1333_v1 = vmov 2   ;;  %v1085_v2 = vld [vmem:[#allocation2 + $0x4] ss:$16 sps:$4 sm:$0xff]  }
  0x37   :  { %299 = vmatprep.mubr.bf16.mxu0 %v1332_v0  ;;  %340 = vmatprep.mubr.bf16.mxu1 %v1332_v0  ;;  %v1087_v3 = vld [vmem:[#allocation2] ss:$16 sps:$4 sm:$0xff]   ;;  %v1088_v4 = vld [vmem:[#allocation2 + $0xc] ss:$16 sps:$4 sm:$0xff]   ;;  %v1090_v5 = vld [vmem:[#allocation2 + $0x8] ss:$16 sps:$4 sm:$0xff]  }
  0x38   :  { %1080 = vset.pattern.permute.xlu0 %v1332_v0  ;;  %1082 = vset.pattern.permute.xlu1 %v1333_v1  ;;  %v1091_v6 = vld [vmem:[#allocation2 + $0x24] ss:$16 sps:$4 sm:$0xff]   ;;  %v1093_v7 = vld [vmem:[#allocation2 + $0x20] ss:$16 sps:$4 sm:$0xff]   ;;  %v1094_v8 = vld [vmem:[#allocation2 + $0x2c] ss:$16 sps:$4 sm:$0xff]  }
  0x39   :  { %267 = vmatprep.subr.bf16.mxu0 %v1085_v2  ;;  %308 = vmatprep.subr.bf16.mxu1 %v1088_v4  ;;  %v1096_v9 = vld [vmem:[#allocation2 + $0x28] ss:$16 sps:$4 sm:$0xff]   ;;  %v1097_v10 = vld [vmem:[#allocation2 + $0x44] ss:$16 sps:$4 sm:$0xff]   ;;  %v1099_v11 = vld [vmem:[#allocation2 + $0x40] ss:$16 sps:$4 sm:$0xff]  }
  0x3a   :  { %268 = vmatpush1.bf16.msra.mxu0 %v1087_v3  ;;  %309 = vmatpush1.bf16.msra.mxu1 %v1090_v5  ;;  %v1100_v12 = vld [vmem:[#allocation2 + $0x4c] ss:$16 sps:$4 sm:$0xff]   ;;  %v1103_v13 = vld [vmem:[#allocation2 + $0x64] ss:$16 sps:$4 sm:$0xff]   ;;  %v1102_v14 = vld [vmem:[#allocation2 + $0x48] ss:$16 sps:$4 sm:$0xff]  }
  0x3b   :  { %269 = vmatprep.subr.bf16.mxu0 %v1091_v6  ;;  %310 = vmatprep.subr.bf16.mxu1 %v1094_v8  ;;  %v1106_v15 = vld [vmem:[#allocation2 + $0x6c] ss:$16 sps:$4 sm:$0xff]   ;;  %v1105_v16 = vld [vmem:[#allocation2 + $0x60] ss:$16 sps:$4 sm:$0xff]   ;;  %v1109_v17 = vld [vmem:[#allocation2 + $0x84] ss:$16 sps:$4 sm:$0xff]  }
  0x3c   :  { %v1108_v18 = vld [vmem:[#allocation2 + $0x68] ss:$16 sps:$4 sm:$0xff]   ;;  %v1112_v19 = vld [vmem:[#allocation2 + $0x8c] ss:$16 sps:$4 sm:$0xff]   ;;  %v1111_v20 = vld [vmem:[#allocation2 + $0x80] ss:$16 sps:$4 sm:$0xff]  }
  0x3d   :  { %v1115_v21 = vld [vmem:[#allocation2 + $0xa4] ss:$16 sps:$4 sm:$0xff]   ;;  %v1114_v22 = vld [vmem:[#allocation2 + $0x88] ss:$16 sps:$4 sm:$0xff]   ;;  %v1118_v23 = vld [vmem:[#allocation2 + $0xac] ss:$16 sps:$4 sm:$0xff]  }
  0x3e   :  { %270 = vmatpush1.bf16.msra.mxu0 %v1093_v7  ;;  %311 = vmatpush1.bf16.msra.mxu1 %v1096_v9  ;;  %v1117_v24 = vld [vmem:[#allocation2 + $0xa0] ss:$16 sps:$4 sm:$0xff]   ;;  %v1121_v25 = vld [vmem:[#allocation2 + $0xc4] ss:$16 sps:$4 sm:$0xff]   ;;  %v1120_v26 = vld [vmem:[#allocation2 + $0xa8] ss:$16 sps:$4 sm:$0xff]  }
  0x3f   :  { %271 = vmatprep.subr.bf16.mxu0 %v1097_v10  ;;  %312 = vmatprep.subr.bf16.mxu1 %v1100_v12  ;;  %v1123_v27 = vld [vmem:[#allocation2 + $0xc0] ss:$16 sps:$4 sm:$0xff]   ;;  %v1124_v29 = vld [vmem:[#allocation2 + $0xcc] ss:$16 sps:$4 sm:$0xff]   ;;  %v1126_v30 = vld [vmem:[#allocation2 + $0xc8] ss:$16 sps:$4 sm:$0xff]  }
  0x40   :  { %v72_v28 = vld [vmem:[%s1489_s1] sm:$0xff]  ;;  %v1130_v32 = vld [vmem:[#allocation2 + $0xec] ss:$16 sps:$4 sm:$0xff]   ;;  %v1334_v35 = vmov 1   ;;  %v1132_v37 = vld [vmem:[#allocation2 + $0xe8] ss:$16 sps:$4 sm:$0xff]  }
  0x41   :  { %352 = vperm.xlu0 %1080, %v72_v28   ;;  %364 = vperm.xlu1 %1082, %v72_v28   ;;  %v1127_v31 = vld [vmem:[#allocation2 + $0xe4] ss:$16 sps:$4 sm:$0xff]   ;;  %v1129_v33 = vld [vmem:[#allocation2 + $0xe0] ss:$16 sps:$4 sm:$0xff]   ;;  %v1335_v38 = vmov 3   ;;  %s1336_s24 = smov [#allocation8]  }
  0x42   :  { %272 = vmatpush1.bf16.msra.mxu0 %v1099_v11  ;;  %313 = vmatpush1.bf16.msra.mxu1 %v1102_v14  ;;  %v73_v34 = vld [vmem:[%s1488_s0] sm:$0xff]  ;;  %v1138_v39 = vld [vmem:[#allocation5 + $0xc] ss:$16 sps:$4 sm:$0xff]   ;;  %v1136_v42 = vld [vmem:[#allocation5 + $0x8] ss:$16 sps:$4 sm:$0xff]   ;;  %s962_s25 = sshll.u32 %s1336_s24, 4  ;;  %s963_s25 = int_to_ptr.vmem [resolvable:$true] %s962_s25 }
  0x43   :  { %273 = vmatprep.subr.bf16.mxu0 %v1103_v13  ;;  %314 = vmatprep.subr.bf16.mxu1 %v1106_v15  ;;  %v1135_v36 = vld [vmem:[#allocation5 + $0x4] ss:$16 sps:$4 sm:$0xff]   ;;  %v1133_v40 = vld [vmem:[#allocation5] ss:$16 sps:$4 sm:$0xff]   ;;  %v74_v41 = vpack.c.bf16 %v73_v34, %v73_v34  ;;  %v1144_v44 = vld [vmem:[#allocation5 + $0x2c] ss:$16 sps:$4 sm:$0xff]   ;;  %p1304_p11 = scmp.lt.s32.totalorder %s963_s25, %s963_s25 }
  0x44   :  { %v1141_v43 = vld [vmem:[#allocation5 + $0x24] ss:$16 sps:$4 sm:$0xff]   ;;  %v1139_v45 = vld [vmem:[#allocation5 + $0x20] ss:$16 sps:$4 sm:$0xff]   ;;  %v1142_v46 = vld [vmem:[#allocation5 + $0x28] ss:$16 sps:$4 sm:$0xff]  }
  0x45   :  { %1081 = vset.pattern.permute.xlu0 %v1334_v35  ;;  %1083 = vset.pattern.permute.xlu1 %v1335_v38  ;;  %v1147_v47 = vld [vmem:[#allocation5 + $0x44] ss:$16 sps:$4 sm:$0xff]   ;;  %v1150_v48 = vld [vmem:[#allocation5 + $0x4c] ss:$16 sps:$4 sm:$0xff]   ;;  %v1145_v49 = vld [vmem:[#allocation5 + $0x40] ss:$16 sps:$4 sm:$0xff]  }
  0x46   :  { %274 = vmatpush1.bf16.msra.mxu0 %v1105_v16  ;;  %315 = vmatpush1.bf16.msra.mxu1 %v1108_v18  ;;  %v1148_v50 = vld [vmem:[#allocation5 + $0x48] ss:$16 sps:$4 sm:$0xff]   ;;  %v1153_v51 = vld [vmem:[#allocation5 + $0x64] ss:$16 sps:$4 sm:$0xff]   ;;  %v1156_v52 = vld [vmem:[#allocation5 + $0x6c] ss:$16 sps:$4 sm:$0xff]  }
  0x47   :  { %275 = vmatprep.subr.bf16.mxu0 %v1109_v17  ;;  %316 = vmatprep.subr.bf16.mxu1 %v1112_v19  ;;  %v1151_v53 = vld [vmem:[#allocation5 + $0x60] ss:$16 sps:$4 sm:$0xff]   ;;  %v1154_v54 = vld [vmem:[#allocation5 + $0x68] ss:$16 sps:$4 sm:$0xff]   ;;  %v1159_v55 = vld [vmem:[#allocation5 + $0x84] ss:$16 sps:$4 sm:$0xff]  }
  0x48   :  { %358 = vperm.xlu0 %1081, %v72_v28   ;;  %370 = vperm.xlu1 %1083, %v72_v28   ;;  %v1162_v56 = vld [vmem:[#allocation5 + $0x8c] ss:$16 sps:$4 sm:$0xff]   ;;  %v1157_v57 = vld [vmem:[#allocation5 + $0x80] ss:$16 sps:$4 sm:$0xff]   ;;  %v1160_v58 = vld [vmem:[#allocation5 + $0x88] ss:$16 sps:$4 sm:$0xff]  }
  0x49   :  { %v1165_v59 = vld [vmem:[#allocation5 + $0xa4] ss:$16 sps:$4 sm:$0xff]   ;;  %v1168_v60 = vld [vmem:[#allocation5 + $0xac] ss:$16 sps:$4 sm:$0xff]   ;;  %v1163_v61 = vld [vmem:[#allocation5 + $0xa0] ss:$16 sps:$4 sm:$0xff]  }
  0x4a   :  { %276 = vmatpush1.bf16.msra.mxu0 %v1111_v20  ;;  %317 = vmatpush1.bf16.msra.mxu1 %v1114_v22  ;;  %v1166_v62 = vld [vmem:[#allocation5 + $0xa8] ss:$16 sps:$4 sm:$0xff]   ;;  %v1171_v63 = vld [vmem:[#allocation5 + $0xc4] ss:$16 sps:$4 sm:$0xff]   ;;  %v1174_v1 = vld [vmem:[#allocation5 + $0xcc] ss:$16 sps:$4 sm:$0xff]  }
  0x4b   :  { %277 = vmatprep.subr.bf16.mxu0 %v1115_v21  ;;  %318 = vmatprep.subr.bf16.mxu1 %v1118_v23  ;;  %v1169_v2 = vld [vmem:[#allocation5 + $0xc0] ss:$16 sps:$4 sm:$0xff]   ;;  %v1172_v3 = vld [vmem:[#allocation5 + $0xc8] ss:$16 sps:$4 sm:$0xff]   ;;  %v1177_v5 = vld [vmem:[#allocation5 + $0xe4] ss:$16 sps:$4 sm:$0xff]  }
  0x4c   :  { %1084 = vset.pattern.permute.xlu0 %v1335_v38  ;;  %v1175_v4 = vld [vmem:[#allocation5 + $0xe0] ss:$16 sps:$4 sm:$0xff]   ;;  %v1178_v6 = vld [vmem:[#allocation5 + $0xe8] ss:$16 sps:$4 sm:$0xff]   ;;  %v1180_v7 = vld [vmem:[#allocation5 + $0xec] ss:$16 sps:$4 sm:$0xff]  }
  0x4d   :  { %v1183_v8 = vld [vmem:[#allocation7 + $0x4] ss:$16 sps:$4 sm:$0xff]   ;;  %v1186_v9 = vld [vmem:[#allocation7 + $0xc] ss:$16 sps:$4 sm:$0xff]  }
  0x4e   :  { %278 = vmatpush1.bf16.msra.mxu0 %v1117_v24  ;;  %319 = vmatpush1.bf16.msra.mxu1 %v1120_v26  ;;  %v349_v14 = vld [vmem:[%s1490_s2] sm:$0xff] }
  0x4f   :  { %279 = vmatprep.subr.bf16.mxu0 %v1121_v25  ;;  %320 = vmatprep.subr.bf16.mxu1 %v1124_v29 }
  0x52   :  { %280 = vmatpush1.bf16.msra.mxu0 %v1123_v27  ;;  %321 = vmatpush1.bf16.msra.mxu1 %v1126_v30 }
  0x53   :  { %281 = vmatprep.subr.bf16.mxu0 %v1127_v31  ;;  %322 = vmatprep.subr.bf16.mxu1 %v1130_v32 }
  0x56   :  { %282 = vmatpush1.bf16.msra.mxu0 %v1129_v33  ;;  %323 = vmatpush1.bf16.msra.mxu1 %v1132_v37  ;;  %v1184_v37 = vld [vmem:[#allocation7 + $0x8] ss:$16 sps:$4 sm:$0xff]  }
  0x57   :  { %574 = vmatprep.subr.bf16.mxu0 %v1135_v36  ;;  %615 = vmatprep.subr.bf16.mxu1 %v1138_v39  ;;  %v1181_v36 = vld [vmem:[#allocation7] ss:$16 sps:$4 sm:$0xff]   ;;  %v1189_v39 = vld [vmem:[#allocation7 + $0x24] ss:$16 sps:$4 sm:$0xff]  }
  0x59   :  { %300 = vmatmul.mubr.bf16.vlgmr.msra.gmra.mrb[0].mxu0 %v74_v41  ;;  %341 = vmatmul.mubr.bf16.vlgmr.msra.gmra.mrb[0].mxu1 %v74_v41  ;;  %v1187_v41 = vld [vmem:[#allocation7 + $0x20] ss:$16 sps:$4 sm:$0xff]  }
  0x5a   :  { %575 = vmatpush1.bf16.msra.mxu0 %v1133_v40  ;;  %606 = vmatprep.mubr.bf16.mxu0 %v1332_v0  ;;  %v1192_v40 = vld [vmem:[#allocation7 + $0x2c] ss:$16 sps:$4 sm:$0xff]  }
  0x5b   :  { %616 = vmatpush1.bf16.msra.mxu1 %v1136_v42  ;;  %647 = vmatprep.mubr.bf16.mxu1 %v1332_v0  ;;  %v1190_v42 = vld [vmem:[#allocation7 + $0x28] ss:$16 sps:$4 sm:$0xff]  }
  0x5c   :  { %576 = vmatprep.subr.bf16.mxu0 %v1141_v43  ;;  %617 = vmatprep.subr.bf16.mxu1 %v1144_v44  ;;  %v1195_v43 = vld [vmem:[#allocation7 + $0x44] ss:$16 sps:$4 sm:$0xff]   ;;  %v1198_v44 = vld [vmem:[#allocation7 + $0x4c] ss:$16 sps:$4 sm:$0xff]  }
  0x5e   :  { %577 = vmatpush1.bf16.msra.mxu0 %v1139_v45  ;;  %v1193_v45 = vld [vmem:[#allocation7 + $0x40] ss:$16 sps:$4 sm:$0xff]  }
  0x5f   :  { %618 = vmatpush1.bf16.msra.mxu1 %v1142_v46  ;;  %578 = vmatprep.subr.bf16.mxu0 %v1147_v47  ;;  %v1196_v46 = vld [vmem:[#allocation7 + $0x48] ss:$16 sps:$4 sm:$0xff]   ;;  %v1201_v47 = vld [vmem:[#allocation7 + $0x64] ss:$16 sps:$4 sm:$0xff]  }
  0x60   :  { %619 = vmatprep.subr.bf16.mxu1 %v1150_v48  ;;  %v1204_v48 = vld [vmem:[#allocation7 + $0x6c] ss:$16 sps:$4 sm:$0xff]  }
  0x62   :  { %579 = vmatpush1.bf16.msra.mxu0 %v1145_v49  ;;  %v1199_v49 = vld [vmem:[#allocation7 + $0x60] ss:$16 sps:$4 sm:$0xff]  }
  0x63   :  { %620 = vmatpush1.bf16.msra.mxu1 %v1148_v50  ;;  %580 = vmatprep.subr.bf16.mxu0 %v1153_v51  ;;  %v1207_v50 = vld [vmem:[#allocation7 + $0x84] ss:$16 sps:$4 sm:$0xff]   ;;  %v1210_v51 = vld [vmem:[#allocation7 + $0x8c] ss:$16 sps:$4 sm:$0xff]  }
  0x64   :  { %621 = vmatprep.subr.bf16.mxu1 %v1156_v52  ;;  %v1205_v52 = vld [vmem:[#allocation7 + $0x80] ss:$16 sps:$4 sm:$0xff]  }
  0x66   :  { %581 = vmatpush1.bf16.msra.mxu0 %v1151_v53  ;;  %v1208_v53 = vld [vmem:[#allocation7 + $0x88] ss:$16 sps:$4 sm:$0xff]  }
  0x67   :  { %622 = vmatpush1.bf16.msra.mxu1 %v1154_v54  ;;  %582 = vmatprep.subr.bf16.mxu0 %v1159_v55  ;;  %v1213_v54 = vld [vmem:[#allocation7 + $0xa4] ss:$16 sps:$4 sm:$0xff]   ;;  %v1216_v55 = vld [vmem:[#allocation7 + $0xac] ss:$16 sps:$4 sm:$0xff]  }
  0x68   :  { %623 = vmatprep.subr.bf16.mxu1 %v1162_v56  ;;  %v1211_v56 = vld [vmem:[#allocation7 + $0xa0] ss:$16 sps:$4 sm:$0xff]  }
  0x6a   :  { %583 = vmatpush1.bf16.msra.mxu0 %v1157_v57  ;;  %v1214_v57 = vld [vmem:[#allocation7 + $0xa8] ss:$16 sps:$4 sm:$0xff]  }
  0x6b   :  { %624 = vmatpush1.bf16.msra.mxu1 %v1160_v58  ;;  %584 = vmatprep.subr.bf16.mxu0 %v1165_v59  ;;  %v1219_v58 = vld [vmem:[#allocation7 + $0xc4] ss:$16 sps:$4 sm:$0xff]   ;;  %v1222_v59 = vld [vmem:[#allocation7 + $0xcc] ss:$16 sps:$4 sm:$0xff]  }
  0x6c   :  { %625 = vmatprep.subr.bf16.mxu1 %v1168_v60  ;;  %v1217_v60 = vld [vmem:[#allocation7 + $0xc0] ss:$16 sps:$4 sm:$0xff]  }
  0x6e   :  { %585 = vmatpush1.bf16.msra.mxu0 %v1163_v61  ;;  %v1220_v61 = vld [vmem:[#allocation7 + $0xc8] ss:$16 sps:$4 sm:$0xff]  }
  0x6f   :  { %626 = vmatpush1.bf16.msra.mxu1 %v1166_v62  ;;  %586 = vmatprep.subr.bf16.mxu0 %v1171_v63  ;;  %v1225_v62 = vld [vmem:[#allocation7 + $0xe4] ss:$16 sps:$4 sm:$0xff]   ;;  %v1228_v63 = vld [vmem:[#allocation7 + $0xec] ss:$16 sps:$4 sm:$0xff]  }
  0x70   :  { %627 = vmatprep.subr.bf16.mxu1 %v1174_v1  ;;  %v1223_v1 = vld [vmem:[#allocation7 + $0xe0] ss:$16 sps:$4 sm:$0xff]  }
  0x72   :  { %587 = vmatpush1.bf16.msra.mxu0 %v1169_v2  ;;  %v1226_v2 = vld [vmem:[#allocation7 + $0xe8] ss:$16 sps:$4 sm:$0xff]  }
  0x73   :  { %628 = vmatpush1.bf16.msra.mxu1 %v1172_v3  ;;  %588 = vmatprep.subr.bf16.mxu0 %v1177_v5 }
  0x74   :  { %629 = vmatprep.subr.bf16.mxu1 %v1180_v7 }
  0x76   :  { %589 = vmatpush1.bf16.msra.mxu0 %v1175_v4  ;;  %v656_v4 = vld [vmem:[%s1491_s3] sm:$0xff] }
  0x77   :  { %630 = vmatpush1.bf16.msra.mxu1 %v1178_v6  ;;  %864 = vmatprep.subr.bf16.mxu0 %v1183_v8 }
  0x78   :  { %905 = vmatprep.subr.bf16.mxu1 %v1186_v9 }
  0xc0   :  { %v1445_v10 = vpop.permute.xlu0 %352  ;;  %v1447_v11 = vpop.permute.xlu1 %364 }
  0xc7   :  { %v1449_v12 = vpop.permute.xlu0 %358  ;;  %v1456_v24 = vpop.permute.xlu1 %370 }
 0x12c   :  { %v301_v13 = vpop.f32.mrb[0].mxu0  ;;  %v342_v17 = vpop.f32.mrb[0].mxu1 }
 0x12d   :  { %v355_v15 = vmul.f32 %v1445_v10, %v301_v13  ;;  %v303_v16 = vpop.f32.mrb[1].mxu0  ;;  %v344_v21 = vpop.f32.mrb[1].mxu1  ;;  %v367_v25 = vmul.f32 %v1447_v11, %v342_v17 }
 0x12e   :  { %v361_v18 = vmul.f32 %v1449_v12, %v303_v16  ;;  %v305_v19 = vpop.f32.mrb[2].mxu0  ;;  %v346_v23 = vpop.f32.mrb[2].mxu1  ;;  %v373_v29 = vmul.f32 %v1456_v24, %v344_v21 }
 0x12f   :  { %v356_v20 = vadd.f32 %v355_v15, %v349_v14  ;;  %v306_v22 = vpop.f32.mrb[3].mxu0  ;;  %v347_v27 = vpop.f32.mrb[3].mxu1 }
 0x131   :  { %v362_v26 = vadd.f32 %v361_v18, %v356_v20 }
 0x133   :  { %v368_v28 = vadd.f32 %v367_v25, %v362_v26 }
 0x135   :  { %v374_v30 = vadd.f32 %v373_v29, %v368_v28 }
 0x137   :  { %v376_v31 = vmin.f32 %v374_v30, 0.0  ;;  %vm375_vm0 = vcmp.gt.f32.partialorder %v374_v30, 0.0 }
 0x139   :  { %v377_v32 = vmul.f32 1.442695, %v376_v31  ;;  %v946_v31 = vld [vmem:[%s1492_s4] sm:$0xff]  ;;  %s1299_s4 = scalar_lea.vmem %s963_s25, 128 }
 0x13a   :  { %p1300_p10 = scmp.ne.s32.totalorder %s963_s25, %s1299_s4  ;;  %p1305_p12 = scmp.lt.s32.totalorder %s1299_s4, %s1299_s4 }
 0x13b   :  { %1229 = vpow2.f32 %v377_v32 }
 0x13c   :  { %p1306_p13 = por %p1305_p12, %p1304_p11 }
 0x13e   :  { %p1307_p0 = pnand %p1306_p13, %p1300_p10 }
 0x145   :  { %v1230_v33 = vpop.eup %1229 }
 0x146   :  { %v1004_v34 = vadd.f32 -1.0, %v1230_v33 }
 0x148   :  { %v380_v35 = vsel %vm375_vm0, %v374_v30, %v1004_v34 }
 0x149   :  { %v381_v38 = vpack.c.bf16 %v380_v35, %v380_v35 }
 0x14b   :  { %607 = vmatmul.mubr.bf16.vlgmr.msra.gmra.mrb[4].mxu0 %v381_v38  ;;  %648 = vmatmul.mubr.bf16.vlgmr.msra.gmra.mrb[4].mxu1 %v381_v38 }
 0x14c   :  { %865 = vmatpush1.bf16.msra.mxu0 %v1181_v36  ;;  %906 = vmatpush1.bf16.msra.mxu1 %v1184_v37 }
 0x14d   :  { %896 = vmatprep.mubr.bf16.mxu0 %v1332_v0  ;;  %937 = vmatprep.mubr.bf16.mxu1 %v1332_v0  ;;  %v1202_v0 = vld [vmem:[#allocation7 + $0x68] ss:$16 sps:$4 sm:$0xff]  }
 0x14e   :  { %866 = vmatprep.subr.bf16.mxu0 %v1189_v39  ;;  %907 = vmatprep.subr.bf16.mxu1 %v1192_v40 }
 0x150   :  { %867 = vmatpush1.bf16.msra.mxu0 %v1187_v41  ;;  %908 = vmatpush1.bf16.msra.mxu1 %v1190_v42 }
 0x151   :  { %868 = vmatprep.subr.bf16.mxu0 %v1195_v43  ;;  %909 = vmatprep.subr.bf16.mxu1 %v1198_v44 }
 0x154   :  { %869 = vmatpush1.bf16.msra.mxu0 %v1193_v45  ;;  %910 = vmatpush1.bf16.msra.mxu1 %v1196_v46 }
 0x155   :  { %870 = vmatprep.subr.bf16.mxu0 %v1201_v47  ;;  %911 = vmatprep.subr.bf16.mxu1 %v1204_v48 }
 0x158   :  { %871 = vmatpush1.bf16.msra.mxu0 %v1199_v49  ;;  %912 = vmatpush1.bf16.msra.mxu1 %v1202_v0 }
 0x159   :  { %872 = vmatprep.subr.bf16.mxu0 %v1207_v50  ;;  %913 = vmatprep.subr.bf16.mxu1 %v1210_v51 }
 0x15c   :  { %873 = vmatpush1.bf16.msra.mxu0 %v1205_v52  ;;  %914 = vmatpush1.bf16.msra.mxu1 %v1208_v53 }
 0x15d   :  { %874 = vmatprep.subr.bf16.mxu0 %v1213_v54  ;;  %915 = vmatprep.subr.bf16.mxu1 %v1216_v55 }
 0x160   :  { %875 = vmatpush1.bf16.msra.mxu0 %v1211_v56  ;;  %916 = vmatpush1.bf16.msra.mxu1 %v1214_v57 }
 0x161   :  { %876 = vmatprep.subr.bf16.mxu0 %v1219_v58  ;;  %917 = vmatprep.subr.bf16.mxu1 %v1222_v59 }
 0x164   :  { %877 = vmatpush1.bf16.msra.mxu0 %v1217_v60  ;;  %918 = vmatpush1.bf16.msra.mxu1 %v1220_v61 }
 0x165   :  { %878 = vmatprep.subr.bf16.mxu0 %v1225_v62  ;;  %919 = vmatprep.subr.bf16.mxu1 %v1228_v63 }
 0x168   :  { %879 = vmatpush1.bf16.msra.mxu0 %v1223_v1  ;;  %920 = vmatpush1.bf16.msra.mxu1 %v1226_v2 }
 0x21e   :  { %v608_v3 = vpop.f32.mrb[4].mxu0  ;;  %v649_v5 = vpop.f32.mrb[4].mxu1 }
 0x21f   :  { %v657_v6 = vmul.f32 %v608_v3, %v1445_v10  ;;  %v610_v7 = vpop.f32.mrb[5].mxu0  ;;  %v651_v8 = vpop.f32.mrb[5].mxu1  ;;  %v661_v18 = vmul.f32 %v649_v5, %v1447_v11 }
 0x220   :  { %v659_v9 = vmul.f32 %v610_v7, %v1449_v12  ;;  %v612_v13 = vpop.f32.mrb[6].mxu0  ;;  %v653_v14 = vpop.f32.mrb[6].mxu1  ;;  %v663_v21 = vmul.f32 %v651_v8, %v1456_v24 }
 0x221   :  { %v658_v15 = vadd.f32 %v657_v6, %v656_v4  ;;  %v613_v16 = vpop.f32.mrb[7].mxu0  ;;  %v654_v17 = vpop.f32.mrb[7].mxu1 }
 0x223   :  { %v660_v19 = vadd.f32 %v659_v9, %v658_v15 }
 0x225   :  { %v662_v20 = vadd.f32 %v661_v18, %v660_v19 }
 0x227   :  { %v664_v22 = vadd.f32 %v663_v21, %v662_v20 }
 0x229   :  { %v666_v23 = vmin.f32 %v664_v22, 0.0  ;;  %vm665_vm1 = vcmp.gt.f32.partialorder %v664_v22, 0.0 }
 0x22b   :  { %v667_v25 = vmul.f32 1.442695, %v666_v23 }
 0x22d   :  { %1231 = vpow2.f32 %v667_v25 }
 0x237   :  { %v1232_v26 = vpop.eup %1231 }
 0x238   :  { %v1037_v27 = vadd.f32 -1.0, %v1232_v26 }
 0x23a   :  { %v670_v28 = vsel %vm665_vm1, %v664_v22, %v1037_v27 }
 0x23b   :  { %v671_v29 = vpack.c.bf16 %v670_v28, %v670_v28 }
 0x23d   :  { %897 = vmatmul.mubr.bf16.vlgmr.msra.gmra.mrb[8].mxu0 %v671_v29  ;;  %938 = vmatmul.mubr.bf16.vlgmr.msra.gmra.mrb[8].mxu1 %v671_v29 }
 0x310   :  { %v898_v30 = vpop.f32.mrb[8].mxu0  ;;  %v939_v32 = vpop.f32.mrb[8].mxu1 }
 0x311   :  { %v947_v33 = vmul.f32 %v898_v30, %v1445_v10  ;;  %v900_v34 = vpop.f32.mrb[9].mxu0  ;;  %v941_v35 = vpop.f32.mrb[9].mxu1  ;;  %v951_v42 = vmul.f32 %v939_v32, %v1447_v11 }
 0x312   :  { %v949_v36 = vmul.f32 %v900_v34, %v1449_v12  ;;  %v902_v37 = vpop.f32.mrb[10].mxu0  ;;  %v943_v38 = vpop.f32.mrb[10].mxu1  ;;  %v953_v45 = vmul.f32 %v941_v35, %v1456_v24 }
 0x313   :  { %v948_v39 = vadd.f32 %v947_v33, %v946_v31  ;;  %v903_v40 = vpop.f32.mrb[11].mxu0  ;;  %v944_v41 = vpop.f32.mrb[11].mxu1 }
 0x315   :  { %v950_v43 = vadd.f32 %v949_v36, %v948_v39 }
 0x317   :  { %v952_v44 = vadd.f32 %v951_v42, %v950_v43 }
 0x319   :  { %v954_v46 = vadd.f32 %v953_v45, %v952_v44 }
 0x31b   :  { %955 = vst [vmem:[#allocation8] sm:$0xff] %v954_v46 }
 0x31c   :  { %1310 = shalt.err (!%p1307_p0)
}
 0x31d   :  { %s1311_s29 = scalar_lea.hbm %s1496_s8, 128 }
 0x31e   :  { %p1312_p1 = scmp.ne.s32.totalorder %s1496_s8, %s1311_s29  ;;  %p1315_p2 = scmp.lt.u32.totalorder %s1311_s29, %s1496_s8 }
 0x320   :  { %p1317_p3 = pnand %p1315_p2, %p1312_p1 }
 0x322   :  { %1320 = shalt.err (!%p1317_p3)
}
 0x323   :  { %965 = dma.vmem_to_hbm [thread:$0]  %s963_s25, 128, %s1496_s8, [#allocation4]  }
 0x324   :  { %1325 = dma.done.wait [#allocation4], 128  }
 0x325   :  { %1326 = vsyncadd [#allocation4], 4294967168 }
 0x326   :  { %969 = vsyncpa [#allocation3], 1 }
 0x327   :  { %970 = vsyncpa [#allocation6], 1 }
 0x328   :  { %971 = vsyncpa [#allocation4], 1 }

</bundles_post_ra>
